<compile_context>
chip_gen: v7x
topology: tpu7x:2x2x1
jax: 0.10.0
libtpu: 0.0.40
codegen_flags: <defaults>
</compile_context>

<pallas_src>
import math
import functools

import jax
import jax.numpy as jnp
from jax import lax
from jax.experimental import pallas as pl
from jax.experimental.pallas import tpu as pltpu


_TILE_BYTES = 1 << 20   # ~1 MiB per block buffer; 3 refs x 2 pipeline buffers
                        # ~= 6 MiB, fits default scoped VMEM on v5e/v6e/v7x.

# xorshift-multiply mix constants (fit in uint32)
_MIX = 0x9E3779B9
_MUL1 = 0x7FEB352D
_MUL2 = 0x846CA68B


def _dropout(y, idx, seed, p):
    """Inverted dropout: keep with prob (1-p), scale kept values by 1/(1-p).

    Stateless counter-based hash of (seed, global element index); pure jnp
    integer ops -> works on TPU (Mosaic) and under interpret mode, and is
    invariant to the block tiling.
    """
    h = idx.astype(jnp.uint32) ^ (seed.astype(jnp.uint32) * jnp.uint32(_MIX))
    h = h ^ (h >> jnp.uint32(16))
    h = h * jnp.uint32(_MUL1)
    h = h ^ (h >> jnp.uint32(15))
    h = h * jnp.uint32(_MUL2)
    h = h ^ (h >> jnp.uint32(16))
    # Integer-threshold keep test on the top 23 bits (no float uniform needed).
    thr = min(int(round(p * (1 << 23))), (1 << 23) - 1)
    keep = (h >> jnp.uint32(9)).astype(jnp.int32) >= jnp.int32(thr)
    return jnp.where(keep, y * jnp.float32(1.0 / (1.0 - p)), jnp.float32(0.0))


def _pe_flat_kernel(seed_ref, x_ref, pe_ref, o_ref, *, p, train, sd, chunk):
    # x_ref/o_ref: (B, CHUNK) lane-dense; pe_ref: (1, CHUNK), broadcast over batch.
    y = x_ref[...].astype(jnp.float32) + pe_ref[...].astype(jnp.float32)
    if train and p > 0.0:
        row = lax.broadcasted_iota(jnp.int32, y.shape, 0)    # batch index
        lane = lax.broadcasted_iota(jnp.int32, y.shape, 1)   # offset within chunk
        idx = row * sd + pl.program_id(0) * chunk + lane     # global flat index
        y = _dropout(y, idx, seed_ref[0], p)
    o_ref[...] = y.astype(o_ref.dtype)


def _pe_3d_kernel(seed_ref, x_ref, pe_ref, o_ref, *, p, train, s, d, s_tile):
    # x_ref/o_ref: (1, S_TILE, D); pe_ref: (1, S_TILE, D) or (1, 1, D) (broadcast).
    y = x_ref[...].astype(jnp.float32) + pe_ref[...].astype(jnp.float32)
    if train and p > 0.0:
        b = pl.program_id(0)
        st = pl.program_id(1)
        row = lax.broadcasted_iota(jnp.int32, y.shape, 1)
        col = lax.broadcasted_iota(jnp.int32, y.shape, 2)
        idx = (b * s + st * s_tile + row) * d + col          # global flat index
        y = _dropout(y, idx, seed_ref[0], p)
    o_ref[...] = y.astype(o_ref.dtype)


def make_pe_buffer(d_model: int, max_len: int):
    """Deterministic sin/cos table, identical to the torch __init__ (after permute)."""
    position = jnp.arange(max_len, dtype=jnp.float32)[:, None]
    div_term = jnp.exp(
        jnp.arange(0, d_model, 2, dtype=jnp.float32) * (-math.log(10000.0) / d_model)
    )
    pe = jnp.zeros((max_len, d_model), dtype=jnp.float32)
    pe = pe.at[:, 0::2].set(jnp.sin(position * div_term))
    pe = pe.at[:, 1::2].set(jnp.cos(position * div_term))
    return pe[None]  # (1, max_len, d_model) -- the permuted registered buffer


def _pick_chunk(total, batch):
    """Largest multiple of 128 dividing `total` with batch*chunk*4B within budget."""
    max_elems = max(128, _TILE_BYTES // (4 * batch))
    best, c = 128, 128
    while c <= total:
        if total % c == 0 and c <= max_elems:
            best = c
        c += 128
    return best


def _pick_s_tile(s, d):
    """Largest S tile that is a multiple of 8 (or full S) within the VMEM budget."""
    max_rows = max(1, _TILE_BYTES // (4 * d))
    if s <= max_rows:
        return s
    best, t = None, 8
    while t <= max_rows:
        if s % t == 0:
            best = t
        t += 8
    return best if best is not None else s   # pathological S: fall back to full rows


def positional_encoding_forward(x, pe, rel_times=None, *, p=0.1, train=False, seed=0):
    """Pallas forward of the torch PositionalEncoding module.

    x: (B, S, D) float. pe: (1, max_len, D) from make_pe_buffer.
    rel_times: None, int (B,) (one pe row per batch element, as in the torch
    loop), or int (B, S) (per-token rows).
    """
    B, S, D = x.shape
    if train and not (0.0 <= p < 1.0):
        raise ValueError("dropout p must be in [0, 1) in training mode")
    if rel_times is None and S > pe.shape[1]:
        raise ValueError("sequence length exceeds positional-encoding max_len")

    seed_arr = jnp.asarray([seed], dtype=jnp.int32)
    cparams = dict(vmem_limit_bytes=32 * 1024 * 1024)

    # ---------------- lane-dense flattened fast path (D < 128) ----------------
    use_flat = (
        rel_times is None
        and (S * D) % 128 == 0
        and D % 128 != 0                 # if D is a multiple of 128 the 3-D path is already lane-dense
        and B * 128 * 4 <= _TILE_BYTES
    )
    if use_flat:
        sd = S * D
        chunk = _pick_chunk(sd, B)
        n_chunks = sd // chunk
        x2 = x.reshape(B, sd)                       # free reshape (contiguous)
        pe2 = pe[0, :S, :].reshape(1, sd)
        kernel = functools.partial(_pe_flat_kernel, p=float(p), train=bool(train),
                                   sd=sd, chunk=chunk)
        grid_spec = pltpu.PrefetchScalarGridSpec(
            num_scalar_prefetch=1,                   # seed -> SMEM
            grid=(n_chunks,),
            in_specs=[
                pl.BlockSpec((B, chunk), lambda c, seed_ref: (0, c)),
                pl.BlockSpec((1, chunk), lambda c, seed_ref: (0, c)),
            ],
            out_specs=pl.BlockSpec((B, chunk), lambda c, seed_ref: (0, c)),
        )
        out = pl.pallas_call(
            kernel,
            out_shape=jax.ShapeDtypeStruct((B, sd), x.dtype),
            grid_spec=grid_spec,
            compiler_params=pltpu.CompilerParams(
                dimension_semantics=("parallel",), **cparams),
            cost_estimate=pl.CostEstimate(
                flops=B * sd, transcendentals=0,
                bytes_accessed=2 * x2.size * x2.dtype.itemsize
                + pe2.size * pe2.dtype.itemsize),
        )(seed_arr, x2, pe2)
        return out.reshape(B, S, D)

    # ---------------- general 3-D tiled path ----------------
    if rel_times is None:
        pe_in = pe[:, :S, :]                        # (1, S, D): varies along S
    else:
        rel_times = jnp.asarray(rel_times, dtype=jnp.int32)
        if rel_times.ndim == 1:
            # One pe row per batch element (the torch loop).  Keep it (B, 1, D)
            # and broadcast inside the kernel -- no (B, S, D) HBM materialization.
            pe_in = jnp.take(pe[0], rel_times, axis=0)[:, None, :]
        else:
            # TODO(synk): per-token (B, S) gather still materializes (B, S, D)
            # in HBM via XLA; fold it into the kernel with scalar-prefetched
            # rel_times (pl.Element row gather) if this path becomes hot.
            pe_in = jnp.take(pe[0], rel_times, axis=0)

    s_tile = _pick_s_tile(S, D)
    assert S % s_tile == 0
    pb_full = pe_in.shape[0] == B
    ps_full = pe_in.shape[1] == S

    def x_index(b, st, seed_ref):
        return (b, st, 0)

    def pe_index(b, st, seed_ref):
        return (b if pb_full else 0, st if ps_full else 0, 0)

    pe_block = (1, s_tile if ps_full else 1, D)

    kernel = functools.partial(_pe_3d_kernel, p=float(p), train=bool(train),
                               s=S, d=D, s_tile=s_tile)
    grid_spec = pltpu.PrefetchScalarGridSpec(
        num_scalar_prefetch=1,
        grid=(B, S // s_tile),
        in_specs=[
            pl.BlockSpec((1, s_tile, D), x_index),
            pl.BlockSpec(pe_block, pe_index),
        ],
        out_specs=pl.BlockSpec((1, s_tile, D), x_index),
    )
    return pl.pallas_call(
        kernel,
        out_shape=jax.ShapeDtypeStruct((B, S, D), x.dtype),
        grid_spec=grid_spec,
        compiler_params=pltpu.CompilerParams(
            dimension_semantics=("parallel", "parallel"), **cparams),
        cost_estimate=pl.CostEstimate(
            flops=B * S * D, transcendentals=0,
            bytes_accessed=2 * x.size * x.dtype.itemsize
            + pe_in.size * pe_in.dtype.itemsize),
    )(seed_arr, x, pe_in)


if __name__ == "__main__":
    key = jax.random.PRNGKey(0)
    B, S, D = 2, 8, 32
    max_len = 64

    x = jax.random.normal(key, (B, S, D), dtype=jnp.float32)
    pe = make_pe_buffer(D, max_len)

    # 1) eval, rel_times=None -> x + pe[0, :S, :]    (lane-dense flattened path)
    out1 = jax.block_until_ready(positional_encoding_forward(x, pe, None, train=False))
    ref1 = x + pe[0, :S, :][None]
    assert jnp.allclose(out1, ref1, atol=1e-6), "rel_times=None path mismatch"

    # 2) eval, rel_times (B,): x[i] + pe[0, t_i, :]  (3-D path, (B,1,D) pe broadcast)
    rel_times = jnp.array([3, 17], dtype=jnp.int32)
    out2 = jax.block_until_ready(positional_encoding_forward(x, pe, rel_times, train=False))
    ref2 = x + pe[0][rel_times][:, None, :]
    assert jnp.allclose(out2, ref2, atol=1e-6), "rel_times (B,) path mismatch"

    # 3) eval, rel_times (B, S): per-token rows      (3-D path, full pe block)
    rel2d = (jnp.arange(B * S, dtype=jnp.int32).reshape(B, S) * 3) % max_len
    out3 = jax.block_until_ready(positional_encoding_forward(x, pe, rel2d, train=False))
    ref3 = x + pe[0][rel2d]
    assert jnp.allclose(out3, ref3, atol=1e-6), "rel_times (B,S) path mismatch"

    # 4) training: in-kernel inverted dropout (p=0.1), flattened path.
    p = 0.1
    scale = 1.0 / (1.0 - p)
    out4 = jax.block_until_ready(
        positional_encoding_forward(x, pe, None, p=p, train=True, seed=1234))
    dropped4 = jnp.isclose(out4, 0.0, atol=1e-6)
    kept4 = jnp.isclose(out4, ref1 * scale, rtol=1e-5, atol=1e-6)
    assert bool(jnp.all(dropped4 | kept4)), "dropout output not {0, scaled}-valued"
    assert float(jnp.mean(kept4)) > 0.5, "dropout dropped far too many elements"

    # 5) training with rel_times (B,): exercises the 3-D kernel's dropout branch.
    out5 = jax.block_until_ready(
        positional_encoding_forward(x, pe, rel_times, p=p, train=True, seed=1234))
    dropped5 = jnp.isclose(out5, 0.0, atol=1e-6)
    kept5 = jnp.isclose(out5, ref2 * scale, rtol=1e-5, atol=1e-6)
    assert bool(jnp.all(dropped5 | kept5)), "dropout (rel_times) output invalid"
    assert float(jnp.mean(kept5)) > 0.5, "dropout (rel_times) dropped too many"

    print("KERNEL_OK")
</pallas_src>

<mosaic_0001>
module attributes {stable_mosaic.version = 11 : i64} {
  func.func @_pe_flat_kernel(%arg0: i32, %arg1: memref<1xi32, #tpu.memory_space<smem>>, %arg2: memref<2x256xf32, #tpu.memory_space<vmem>>, %arg3: memref<1x256xf32, #tpu.memory_space<vmem>>, %arg4: memref<2x256xf32, #tpu.memory_space<vmem>>) attributes {dimension_semantics = [#tpu.dimension_semantics<parallel>], iteration_bounds = array<i64: 1>, scalar_prefetch = 1 : i64, scratch_operands = 0 : i64, tpu.core_type = #tpu.core_type<tc>, window_params = [{transform_indices = @transform_0, window_bounds = array<i64: 2, 256>}, {transform_indices = @transform_1, window_bounds = array<i64: 1, 256>}, {transform_indices = @transform_2, window_bounds = array<i64: 2, 256>}]} {
    %c0 = arith.constant 0 : index
    %c0_0 = arith.constant 0 : index
    %0 = vector.load %arg2[%c0, %c0_0] : memref<2x256xf32, #tpu.memory_space<vmem>>, vector<2x256xf32>
    %c0_1 = arith.constant 0 : index
    %c0_2 = arith.constant 0 : index
    %1 = vector.load %arg3[%c0_1, %c0_2] : memref<1x256xf32, #tpu.memory_space<vmem>>, vector<1x256xf32>
    %2 = vector.broadcast %1 : vector<1x256xf32> to vector<2x256xf32>
    %3 = arith.addf %0, %2 : vector<2x256xf32>
    %c0_3 = arith.constant 0 : index
    %c0_4 = arith.constant 0 : index
    %4 = vector.load %arg4[%c0_3, %c0_4] : memref<2x256xf32, #tpu.memory_space<vmem>>, vector<2x256xf32>
    tpu.vector_store %arg4[%c0_3, %c0_4], %3 {strides = array<i32>} : memref<2x256xf32, #tpu.memory_space<vmem>>, vector<2x256xf32>,
    return
  }
  func.func @transform_0(%arg0: i32, %arg1: memref<1xi32, #tpu.memory_space<smem>>) -> (i32, i32) {
    %c0_i32 = arith.constant 0 : i32
    %c0_i32_0 = arith.constant 0 : i32
    return %c0_i32, %arg0 : i32, i32
  }
  func.func @transform_1(%arg0: i32, %arg1: memref<1xi32, #tpu.memory_space<smem>>) -> (i32, i32) {
    %c0_i32 = arith.constant 0 : i32
    %c0_i32_0 = arith.constant 0 : i32
    return %c0_i32, %arg0 : i32, i32
  }
  func.func @transform_2(%arg0: i32, %arg1: memref<1xi32, #tpu.memory_space<smem>>) -> (i32, i32) {
    %c0_i32 = arith.constant 0 : i32
    %c0_i32_0 = arith.constant 0 : i32
    return %c0_i32, %arg0 : i32, i32
  }
}

</mosaic_0001>

<bundles_post_ra>
// kernel: tpu_custom_call.1
= control target key start
LH: loop header
LB: loop body
LE: loop exit
PB: predicated region body
PF: predicated region fallthrough
CT: control target
= control target key end

     0   :  { %9 = vsyncpa [#allocation5], 0  ;;  %s164_s0 = inlined_call_operand.<no memory space> [shape: s32[1], index: 0, kind: input, shape index: {}]   ;;  %s165_s1 = inlined_call_operand.hbm [shape: f32[2,256], index: 1, kind: input, shape index: {}]   ;;  %s166_s2 = inlined_call_operand.vmem [shape: f32[1,256], index: 2, kind: input, shape index: {}]   ;;  %s167_s3 = inlined_call_operand.hbm [shape: f32[2,256], index: 3, kind: output, shape index: {}]  }
   0x1   :  { %10 = vsyncpa [#allocation6], 0  ;;  %s114_s12 = smov [#allocation4]   ;;  %s66_s16 = scalar_lea.hbm %s165_s1, 64 }
   0x2   :  { %s17_s13 = sshll.u32 %s114_s12, 4  ;;  %p67_p0 = scmp.ne.s32.totalorder %s165_s1, %s66_s16  ;;  %s18_s13 = int_to_ptr.vmem [resolvable:$true] %s17_s13 }
   0x3   :  { %p70_p1 = scmp.lt.u32.totalorder %s66_s16, %s165_s1 }
   0x5   :  { %p72_p2 = pnand %p70_p1, %p67_p0 }
   0x7   :  { %75 = shalt.err (!%p72_p2)
}
   0x8   :  { %s76_s20 = scalar_lea.vmem %s18_s13, 64  ;;  %p81_p4 = scmp.lt.s32.totalorder %s18_s13, %s18_s13 }
   0x9   :  { %p77_p3 = scmp.ne.s32.totalorder %s18_s13, %s76_s20  ;;  %p82_p5 = scmp.lt.s32.totalorder %s76_s20, %s76_s20 }
   0xb   :  { %p83_p6 = por %p82_p5, %p81_p4 }
   0xd   :  { %p84_p7 = pnand %p83_p6, %p77_p3 }
   0xf   :  { %87 = shalt.err (!%p84_p7)
}
  0x10   :  { %20 = dma.hbm_to_vmem [thread:$0]  %s165_s1, 64, %s18_s13, [#allocation5]  }
  0x11   :  { %110 = dma.done.wait [#allocation5], 64  }
  0x12   :  { %111 = vsyncadd [#allocation5], 4294967232  ;;  %v29_v0 = vlaneseq  ;;  %v115_v1 = vmov 1983009808   ;;  %v27_v7 = vld [vmem:[%s166_s2] sm:$0x3] }
  0x13   :  { %v39_v2 = vunpack.c.l.s4 %v115_v1  ;;  %v26_v12 = vld [vmem:[#allocation4] sm:$0xf]  ;;  %s116_s25 = smov [#allocation7]  }
  0x14   :  { %v30_v3 = vshrl.u32 %v29_v0, 7  ;;  %s54_s1 = sshll.u32 %s116_s25, 4  ;;  %s55_s1 = int_to_ptr.vmem [resolvable:$true] %s54_s1 }
  0x15   :  { %v40_v6 = vunpack.c.0.s8 %v39_v2  ;;  %s88_s26 = scalar_lea.vmem %s55_s1, 64  ;;  %p93_p9 = scmp.lt.s32.totalorder %s55_s1, %s55_s1 }
  0x16   :  { %v31_v4 = vsub.s32 0, %v30_v3  ;;  %v35_v5 = vsub.s32 1, %v30_v3  ;;  %p89_p8 = scmp.ne.s32.totalorder %s55_s1, %s88_s26  ;;  %p94_p10 = scmp.lt.s32.totalorder %s88_s26, %s88_s26 }
  0x17   :  { %v43_v10 = vsub.s32 %v40_v6, %v30_v3 }
  0x18   :  { %v32_v8 = vrot.slane %v27_v7, %v31_v4  ;;  %v36_v9 = vrot.slane %v27_v7, %v35_v5  ;;  %p95_p11 = por %p94_p10, %p93_p9 }
  0x1a   :  { %v37_v11 = vcombine.low %v32_v8, %v36_v9  ;;  %p96_p12 = pnand %p95_p11, %p89_p8 }
  0x1c   :  { %v44_v13 = vrot.slane %v37_v11, %v43_v10 }
  0x1e   :  { %v46_v14 = vadd.f32 %v44_v13, %v26_v12 }
  0x20   :  { %47 = vst [vmem:[#allocation7] sm:$0xf] %v46_v14 }
  0x21   :  { %99 = shalt.err (!%p96_p12)
}
  0x22   :  { %s100_s28 = scalar_lea.hbm %s167_s3, 64 }
  0x23   :  { %p101_p13 = scmp.ne.s32.totalorder %s167_s3, %s100_s28  ;;  %p104_p0 = scmp.lt.u32.totalorder %s100_s28, %s167_s3 }
  0x25   :  { %p106_p1 = pnand %p104_p0, %p101_p13 }
  0x27   :  { %109 = shalt.err (!%p106_p1)
}
  0x28   :  { %57 = dma.vmem_to_hbm [thread:$0]  %s55_s1, 64, %s167_s3, [#allocation6]  }
  0x29   :  { %112 = dma.done.wait [#allocation6], 64  }
  0x2a   :  { %113 = vsyncadd [#allocation6], 4294967232 }
  0x2b   :  { %61 = vsyncpa [#allocation5], 1 }
  0x2c   :  { %62 = vsyncpa [#allocation6], 1 }

</bundles_post_ra>
